<compile_context>
chip_gen: v7x
topology: tpu7x:2x2x1
jax: 0.10.0
libtpu: 0.0.40
codegen_flags: <defaults>
</compile_context>

<pallas_src>
import jax
import jax.numpy as jnp
from jax.experimental import pallas as pl
from jax.experimental.pallas import tpu as pltpu

HIDDEN1 = 128
HIDDEN2 = 64
LANE = 128                    # class-axis padding target (lane-dense stores)
MAX_TB = 2048                 # batch-tile ceiling (rows)
SPLIT_THRESHOLD = 1024        # above this, force >=2 grid steps (v7x has 2 TensorCores)
VMEM_TILE_BUDGET = 24 << 20   # per-tile working-set budget; safe on v7x (64 MiB physical)
VMEM_LIMIT_BYTES = 48 << 20   # raise scoped-VMEM limit (v5e default is only 16 MiB)
NEG_BIG = -1e30               # bias for padded class cols -> exp() underflows to exactly 0
                              # (safe only while biases + accumulation stay f32)


def _round_up(n, m):
    return ((n + m - 1) // m) * m


def _pick_tb(batch, input_size, c_pad):
    """Batch-tile rows: as big as the VMEM budget allows, multiple of 8 (or == batch)."""
    # Per-row VMEM estimate: double-buffered f32 x tile + in-kernel bf16 copy,
    # double-buffered bf16 out tile, f32/bf16 intermediates (h1, h2, logits, exp, out).
    bytes_per_row = (
        2 * input_size * 4 + input_size * 2      # x double buffer (f32) + bf16 cast copy
        + 2 * c_pad * 2                          # out double buffer (bf16)
        + (HIDDEN1 + HIDDEN2) * 6                # h1, h2 (f32 + bf16)
        + 3 * c_pad * 4                          # logits, exp, pre-cast out (f32)
    )
    cap = min(MAX_TB, max(8, (VMEM_TILE_BUDGET // bytes_per_row) // 8 * 8))
    if batch <= cap:
        if batch > SPLIT_THRESHOLD:
            # Large single-tile batch: split into >=2 grid steps so both v7x TCs run.
            return _round_up(-(-batch // 2), 8)
        return batch  # block == full batch dim (allowed even if not a multiple of 8)
    return cap


def mlp_kernel(x_ref, w1_ref, b1_ref, w2_ref, b2_ref, w3_ref, b3_ref, o_ref):
    # x arrives as f32 (4 B/elem HBM stream); cast to bf16 on the VPU, hidden under DMA.
    x = x_ref[...].astype(jnp.bfloat16)                                 # (TB, D)

    # fc1 + relu   (bf16 operands, f32 accumulation on the MXU)
    h1 = jnp.dot(x, w1_ref[...], preferred_element_type=jnp.float32) + b1_ref[...]
    h1 = jnp.maximum(h1, 0.0).astype(jnp.bfloat16)

    # fc2 + relu
    h2 = jnp.dot(h1, w2_ref[...], preferred_element_type=jnp.float32) + b2_ref[...]
    h2 = jnp.maximum(h2, 0.0).astype(jnp.bfloat16)

    # fc3 (class axis padded to LANE; padded columns carry a -1e30 f32 bias)
    logits = jnp.dot(h2, w3_ref[...], preferred_element_type=jnp.float32) + b3_ref[...]

    # softmax over the class axis (dim=1 of the 2-D input)
    m = jnp.max(logits, axis=-1, keepdims=True)
    e = jnp.exp(logits - m)                                             # padded cols -> 0
    denom = jnp.sum(e, axis=-1, keepdims=True)
    o_ref[...] = (e * pl.reciprocal(denom, approx=True)).astype(o_ref.dtype)


def mlp_forward(x, params, out_dtype=jnp.bfloat16):
    """x: (batch, input_size) f32. Returns (batch, num_classes) probabilities (out_dtype)."""
    w1, b1, w2, b2, w3, b3 = (
        params["w1"], params["b1"], params["w2"],
        params["b2"], params["w3"], params["b3"],
    )
    batch, input_size = x.shape
    num_classes = w3.shape[1]
    c_pad = _round_up(num_classes, LANE)

    tb = _pick_tb(batch, input_size, c_pad)
    grid = (pl.cdiv(batch, tb),)   # ragged last block is masked by Pallas; no x padding pass

    # Weights small -> cast/pad in the wrapper is negligible. Biases stay f32 (accumulator dtype).
    w1b = w1.astype(jnp.bfloat16)
    w2b = w2.astype(jnp.bfloat16)
    w3b = jnp.pad(w3, ((0, 0), (0, c_pad - num_classes))).astype(jnp.bfloat16)
    b3p = jnp.pad(b3.astype(jnp.float32), ((0, 0), (0, c_pad - num_classes)),
                  constant_values=NEG_BIG)

    # Weights/biases: same block index every step -> stay resident in VMEM across the grid.
    resident = lambda shape: pl.BlockSpec(shape, lambda i: (0, 0))

    out_padded = pl.pallas_call(
        mlp_kernel,
        out_shape=jax.ShapeDtypeStruct((batch, c_pad), out_dtype),
        grid=grid,
        in_specs=[
            pl.BlockSpec((tb, input_size), lambda i: (i, 0)),   # x: pipelined over batch (f32)
            resident((input_size, HIDDEN1)),                    # w1 (bf16)
            resident((1, HIDDEN1)),                             # b1 (f32)
            resident((HIDDEN1, HIDDEN2)),                       # w2 (bf16)
            resident((1, HIDDEN2)),                             # b2 (f32)
            resident((HIDDEN2, c_pad)),                         # w3 (bf16, padded classes)
            resident((1, c_pad)),                               # b3 (f32, padded cols = -1e30)
        ],
        out_specs=pl.BlockSpec((tb, c_pad), lambda i: (i, 0)),  # lane-dense output slab
        compiler_params=pltpu.CompilerParams(
            dimension_semantics=("parallel",),                  # v7x: shard batch over 2 TCs
            vmem_limit_bytes=VMEM_LIMIT_BYTES,                  # v5e scoped default is 16 MiB
        ),
    )(x, w1b, b1.astype(jnp.float32), w2b, b2.astype(jnp.float32), w3b, b3p)

    # Column slice only (no row slice needed). Callers that can consume the lane-padded slab
    # directly should take out_padded as-is to skip this extra pass.
    return out_padded[:, :num_classes]


def init_params(key, input_size, num_classes):
    """Deterministic init mimicking PyTorch nn.Linear default U(-1/sqrt(fan_in), 1/sqrt(fan_in))."""
    def linear(k, fan_in, fan_out):
        kw, kb = jax.random.split(k)
        bound = 1.0 / jnp.sqrt(fan_in)
        w = jax.random.uniform(kw, (fan_in, fan_out), jnp.float32, -bound, bound)
        b = jax.random.uniform(kb, (1, fan_out), jnp.float32, -bound, bound)
        return w, b

    k1, k2, k3 = jax.random.split(key, 3)
    w1, b1 = linear(k1, input_size, HIDDEN1)
    w2, b2 = linear(k2, HIDDEN1, HIDDEN2)
    w3, b3 = linear(k3, HIDDEN2, num_classes)
    return {"w1": w1, "b1": b1, "w2": w2, "b2": b2, "w3": w3, "b3": b3}


def mlp_reference(x, params):
    h1 = jnp.maximum(x @ params["w1"] + params["b1"], 0.0)
    h2 = jnp.maximum(h1 @ params["w2"] + params["b2"], 0.0)
    logits = h2 @ params["w3"] + params["b3"]
    return jax.nn.softmax(logits, axis=1)


if __name__ == "__main__":
    key = jax.random.PRNGKey(0)
    k_params, k_x = jax.random.split(key)

    batch, input_size, num_classes = 2, 32, 10
    params = init_params(k_params, input_size, num_classes)
    x = jax.random.normal(k_x, (batch, input_size), jnp.float32)

    out = mlp_forward(x, params)
    out = jax.block_until_ready(out)

    ref = mlp_reference(x, params)
    out_f32 = out.astype(jnp.float32)
    assert out.shape == (batch, num_classes)
    # bf16 matmul operands + bf16 output + approx reciprocal -> loosened (still tight for
    # probabilities) tolerances.
    assert jnp.allclose(out_f32, ref, atol=2e-2, rtol=0.0), jnp.max(jnp.abs(out_f32 - ref))
    assert jnp.allclose(jnp.sum(out_f32, axis=1), 1.0, atol=1e-2)

    print("KERNEL_OK")
</pallas_src>

<mosaic_0001>
module attributes {stable_mosaic.version = 11 : i64} {
  func.func @mlp_kernel(%arg0: i32, %arg1: memref<2x32xf32, #tpu.memory_space<vmem>>, %arg2: memref<32x128xbf16, #tpu.memory_space<vmem>>, %arg3: memref<1x128xf32, #tpu.memory_space<vmem>>, %arg4: memref<128x64xbf16, #tpu.memory_space<vmem>>, %arg5: memref<1x64xf32, #tpu.memory_space<vmem>>, %arg6: memref<64x128xbf16, #tpu.memory_space<vmem>>, %arg7: memref<1x128xf32, #tpu.memory_space<vmem>>, %arg8: memref<2x128xbf16, #tpu.memory_space<vmem>>) attributes {dimension_semantics = [#tpu.dimension_semantics<parallel>], iteration_bounds = array<i64: 1>, scalar_prefetch = 0 : i64, scratch_operands = 0 : i64, tpu.core_type = #tpu.core_type<tc>, window_params = [{transform_indices = @transform_0, window_bounds = array<i64: 2, 32>}, {pipeline_mode = #tpu.pipeline_mode<synchronous>, transform_indices = @transform_1, window_bounds = array<i64: 32, 128>}, {pipeline_mode = #tpu.pipeline_mode<synchronous>, transform_indices = @transform_2, window_bounds = array<i64: 1, 128>}, {pipeline_mode = #tpu.pipeline_mode<synchronous>, transform_indices = @transform_3, window_bounds = array<i64: 128, 64>}, {pipeline_mode = #tpu.pipeline_mode<synchronous>, transform_indices = @transform_4, window_bounds = array<i64: 1, 64>}, {pipeline_mode = #tpu.pipeline_mode<synchronous>, transform_indices = @transform_5, window_bounds = array<i64: 64, 128>}, {pipeline_mode = #tpu.pipeline_mode<synchronous>, transform_indices = @transform_6, window_bounds = array<i64: 1, 128>}, {transform_indices = @transform_7, window_bounds = array<i64: 2, 128>}]} {
    %c0 = arith.constant 0 : index
    %c0_0 = arith.constant 0 : index
    %0 = vector.load %arg1[%c0, %c0_0] : memref<2x32xf32, #tpu.memory_space<vmem>>, vector<2x32xf32>
    %1 = arith.truncf %0 : vector<2x32xf32> to vector<2x32xbf16>
    %c0_1 = arith.constant 0 : index
    %c0_2 = arith.constant 0 : index
    %2 = vector.load %arg2[%c0_1, %c0_2] : memref<32x128xbf16, #tpu.memory_space<vmem>>, vector<32x128xbf16>
    %cst = arith.constant dense<0.000000e+00> : vector<2x128xf32>
    %3 = tpu.matmul %1, %2, %cst {dimension_numbers = #tpu.dot_dimension_numbers<[1], [0], [0], [1], [0, 0, 1, 1], [], []>} : vector<2x32xbf16>, vector<32x128xbf16>, vector<2x128xf32> -> vector<2x128xf32>
    %c0_3 = arith.constant 0 : index
    %c0_4 = arith.constant 0 : index
    %4 = vector.load %arg3[%c0_3, %c0_4] : memref<1x128xf32, #tpu.memory_space<vmem>>, vector<1x128xf32>
    %5 = vector.broadcast %4 : vector<1x128xf32> to vector<2x128xf32>
    %6 = arith.addf %3, %5 : vector<2x128xf32>
    %cst_5 = arith.constant 0.000000e+00 : f32
    %7 = vector.broadcast %cst_5 : f32 to vector<2x128xf32>
    %8 = arith.maximumf %6, %7 : vector<2x128xf32>
    %9 = arith.truncf %8 : vector<2x128xf32> to vector<2x128xbf16>
    %c0_6 = arith.constant 0 : index
    %c0_7 = arith.constant 0 : index
    %10 = vector.load %arg4[%c0_6, %c0_7] : memref<128x64xbf16, #tpu.memory_space<vmem>>, vector<128x64xbf16>
    %cst_8 = arith.constant dense<0.000000e+00> : vector<2x64xf32>
    %11 = tpu.matmul %9, %10, %cst_8 {dimension_numbers = #tpu.dot_dimension_numbers<[1], [0], [0], [1], [0, 0, 1, 1], [], []>} : vector<2x128xbf16>, vector<128x64xbf16>, vector<2x64xf32> -> vector<2x64xf32>
    %c0_9 = arith.constant 0 : index
    %c0_10 = arith.constant 0 : index
    %12 = vector.load %arg5[%c0_9, %c0_10] : memref<1x64xf32, #tpu.memory_space<vmem>>, vector<1x64xf32>
    %13 = vector.broadcast %12 : vector<1x64xf32> to vector<2x64xf32>
    %14 = arith.addf %11, %13 : vector<2x64xf32>
    %cst_11 = arith.constant 0.000000e+00 : f32
    %15 = vector.broadcast %cst_11 : f32 to vector<2x64xf32>
    %16 = arith.maximumf %14, %15 : vector<2x64xf32>
    %17 = arith.truncf %16 : vector<2x64xf32> to vector<2x64xbf16>
    %c0_12 = arith.constant 0 : index
    %c0_13 = arith.constant 0 : index
    %18 = vector.load %arg6[%c0_12, %c0_13] : memref<64x128xbf16, #tpu.memory_space<vmem>>, vector<64x128xbf16>
    %cst_14 = arith.constant dense<0.000000e+00> : vector<2x128xf32>
    %19 = tpu.matmul %17, %18, %cst_14 {dimension_numbers = #tpu.dot_dimension_numbers<[1], [0], [0], [1], [0, 0, 1, 1], [], []>} : vector<2x64xbf16>, vector<64x128xbf16>, vector<2x128xf32> -> vector<2x128xf32>
    %c0_15 = arith.constant 0 : index
    %c0_16 = arith.constant 0 : index
    %20 = vector.load %arg7[%c0_15, %c0_16] : memref<1x128xf32, #tpu.memory_space<vmem>>, vector<1x128xf32>
    %21 = vector.broadcast %20 : vector<1x128xf32> to vector<2x128xf32>
    %22 = arith.addf %19, %21 : vector<2x128xf32>
    %cst_17 = arith.constant dense<0xFF800000> : vector<2xf32>
    %23 = vector.multi_reduction <maximumf>, %22, %cst_17 [1] : vector<2x128xf32> to vector<2xf32>
    %24 = vector.shape_cast %23 : vector<2xf32> to vector<2x1xf32>
    %25 = vector.broadcast %24 : vector<2x1xf32> to vector<2x128xf32>
    %26 = arith.subf %22, %25 : vector<2x128xf32>
    %27 = math.exp %26 : vector<2x128xf32>
    %cst_18 = arith.constant dense<0.000000e+00> : vector<2xf32>
    %28 = vector.multi_reduction <add>, %27, %cst_18 [1] : vector<2x128xf32> to vector<2xf32>
    %29 = vector.shape_cast %28 : vector<2xf32> to vector<2x1xf32>
    %30 = tpu.reciprocal %29 {approx = true} : vector<2x1xf32> -> vector<2x1xf32>
    %31 = vector.broadcast %30 : vector<2x1xf32> to vector<2x128xf32>
    %32 = arith.mulf %27, %31 : vector<2x128xf32>
    %33 = arith.truncf %32 : vector<2x128xf32> to vector<2x128xbf16>
    %c0_19 = arith.constant 0 : index
    %c0_20 = arith.constant 0 : index
    %34 = vector.load %arg8[%c0_19, %c0_20] : memref<2x128xbf16, #tpu.memory_space<vmem>>, vector<2x128xbf16>
    tpu.vector_store %arg8[%c0_19, %c0_20], %33 {strides = array<i32>} : memref<2x128xbf16, #tpu.memory_space<vmem>>, vector<2x128xbf16>,
    return
  }
  func.func @transform_0(%arg0: i32) -> (i32, i32) {
    %c0_i32 = arith.constant 0 : i32
    %c0_i32_0 = arith.constant 0 : i32
    return %arg0, %c0_i32 : i32, i32
  }
  func.func @transform_1(%arg0: i32) -> (i32, i32) {
    %c0_i32 = arith.constant 0 : i32
    %c0_i32_0 = arith.constant 0 : i32
    %c0_i32_1 = arith.constant 0 : i32
    return %c0_i32, %c0_i32_0 : i32, i32
  }
  func.func @transform_2(%arg0: i32) -> (i32, i32) {
    %c0_i32 = arith.constant 0 : i32
    %c0_i32_0 = arith.constant 0 : i32
    %c0_i32_1 = arith.constant 0 : i32
    return %c0_i32, %c0_i32_0 : i32, i32
  }
  func.func @transform_3(%arg0: i32) -> (i32, i32) {
    %c0_i32 = arith.constant 0 : i32
    %c0_i32_0 = arith.constant 0 : i32
    %c0_i32_1 = arith.constant 0 : i32
    return %c0_i32, %c0_i32_0 : i32, i32
  }
  func.func @transform_4(%arg0: i32) -> (i32, i32) {
    %c0_i32 = arith.constant 0 : i32
    %c0_i32_0 = arith.constant 0 : i32
    %c0_i32_1 = arith.constant 0 : i32
    return %c0_i32, %c0_i32_0 : i32, i32
  }
  func.func @transform_5(%arg0: i32) -> (i32, i32) {
    %c0_i32 = arith.constant 0 : i32
    %c0_i32_0 = arith.constant 0 : i32
    %c0_i32_1 = arith.constant 0 : i32
    return %c0_i32, %c0_i32_0 : i32, i32
  }
  func.func @transform_6(%arg0: i32) -> (i32, i32) {
    %c0_i32 = arith.constant 0 : i32
    %c0_i32_0 = arith.constant 0 : i32
    %c0_i32_1 = arith.constant 0 : i32
    return %c0_i32, %c0_i32_0 : i32, i32
  }
  func.func @transform_7(%arg0: i32) -> (i32, i32) {
    %c0_i32 = arith.constant 0 : i32
    %c0_i32_0 = arith.constant 0 : i32
    return %arg0, %c0_i32 : i32, i32
  }
}

</mosaic_0001>

<bundles_post_ra>
// kernel: tpu_custom_call.1
= control target key start
LH: loop header
LB: loop body
LE: loop exit
PB: predicated region body
PF: predicated region fallthrough
CT: control target
= control target key end

     0   :  { %v444_v1 = vmov 0.0   ;;  %vm445_vm0 = vmmov 0   ;;  %vm53_vm1 = vcmask 261120   ;;  %s556_s0 = inlined_call_operand.vmem [shape: f32[2,32], index: 0, kind: input, shape index: {}]   ;;  %s557_s1 = inlined_call_operand.vmem [shape: bf16[32,128], index: 1, kind: input, shape index: {}]   ;;  %s558_s2 = inlined_call_operand.vmem [shape: f32[1,128], index: 2, kind: input, shape index: {}]   ;;  %s559_s3 = inlined_call_operand.vmem [shape: bf16[128,64], index: 3, kind: input, shape index: {}]   ;;  %s560_s4 = inlined_call_operand.vmem [shape: f32[1,64], index: 4, kind: input, shape index: {}]   ;;  %s561_s5 = inlined_call_operand.vmem [shape: bf16[64,128], index: 5, kind: input, shape index: {}]   ;;  %s562_s6 = inlined_call_operand.vmem [shape: f32[1,128], index: 6, kind: input, shape index: {}]   ;;  %s563_s7 = inlined_call_operand.hbm [shape: bf16[2,128], index: 7, kind: output, shape index: {}]  }
   0x1   :  { %v402_v0 = vld [vmem:[%s557_s1] sm:$0xff]   ;;  %359 = vmatprep.subr.bf16.mxu0 %v444_v1  ;;  %v403_v2 = vld [vmem:[%s557_s1 + $0x8] sm:$0xff]   ;;  %367 = vmatprep.subr.bf16.mxu1 %v444_v1  ;;  %v406_v7 = vld [vmem:[%s559_s3 + $0x10] sm:$0xff]  }
   0x2   :  { %360 = vmatpush3.bf16.msra.mxu0 %v402_v0  ;;  %363 = vmatprep.mubr.msk.bf16.mxu0 %vm445_vm0, %v444_v1  ;;  %v28_v3 = vld [vmem:[%s556_s0] sm:$0x3]  ;;  %v405_v5 = vld [vmem:[%s559_s3 + $0x8] sm:$0xff]   ;;  %v407_v8 = vld [vmem:[%s559_s3 + $0x18] sm:$0xff]  }
   0x3   :  { %v404_v4 = vld [vmem:[%s559_s3] sm:$0xff]   ;;  %361 = vmatprep.subr.bf16.mxu0 %v444_v1  ;;  %383 = vmatprep.mubr.msk.bf16.mxu1 %vm445_vm0, %v444_v1  ;;  %v29_v6 = vpack.c.bf16 %v28_v3, %v28_v3 }
   0x4   :  { %368 = vmatpush3.bf16.msra.mxu1 %v404_v4 }
   0x5   :  { %369 = vmatprep.subr.bf16.mxu1 %v444_v1 }
   0x6   :  { %362 = vmatpush3.bf16.msra.mxu0 %v403_v2 }
   0x7   :  { %387 = vmatprep.subr.bf16.mxu0 %v444_v1 }
   0x8   :  { %370 = vmatpush3.bf16.msra.mxu1 %v405_v5 }
   0x9   :  { %364 = vmatmul.mubr.msk.bf16.vlgmr.msra.gmra.mrb[0].mxu0 %vm53_vm1, %v29_v6  ;;  %371 = vmatprep.subr.bf16.mxu1 %v444_v1 }
   0xa   :  { %395 = vmatprep.mubr.msk.bf16.mxu0 %vm445_vm0, %v444_v1 }
   0xc   :  { %372 = vmatpush3.bf16.msra.mxu1 %v406_v7 }
   0xd   :  { %12 = vsyncpa [#allocation3], 0  ;;  %373 = vmatprep.subr.bf16.mxu1 %v444_v1  ;;  %v408_v9 = vld [vmem:[%s559_s3 + $0x20] sm:$0xff]   ;;  %v409_v10 = vld [vmem:[%s559_s3 + $0x28] sm:$0xff]   ;;  %vm251_vm2 = vcmask 523264   ;;  %vm295_vm3 = vcmask 1041408  }
   0xe   :  { %v410_v11 = vld [vmem:[%s559_s3 + $0x30] sm:$0xff]   ;;  %v411_v12 = vld [vmem:[%s559_s3 + $0x38] sm:$0xff]   ;;  %v412_v13 = vld [vmem:[%s561_s5] sm:$0xff]  }
   0xf   :  { %388 = vmatpush3.bf16.msra.mxu0 %v412_v13  ;;  %v413_v14 = vld [vmem:[%s561_s5 + $0x8] sm:$0xff]   ;;  %v323_v15 = vld [vmem:[%s558_s2] ss:$0 sm:$0xff]  ;;  %v414_v23 = vld [vmem:[%s561_s5 + $0x10] sm:$0xff]  }
  0x10   :  { %374 = vmatpush3.bf16.msra.mxu1 %v407_v8  ;;  %389 = vmatprep.subr.bf16.mxu0 %v444_v1  ;;  %v415_v24 = vld [vmem:[%s561_s5 + $0x18] sm:$0xff]   ;;  %v327_v25 = vld [vmem:[%s560_s4] ss:$0 sm:$0xff]  ;;  %s446_s4 = smov [#allocation2]  }
  0x11   :  { %375 = vmatprep.subr.bf16.mxu1 %v444_v1  ;;  %v336_v33 = vld [vmem:[%s562_s6] ss:$0 sm:$0xff]  ;;  %s315_s5 = sshll.u32 %s446_s4, 4  ;;  %s316_s5 = int_to_ptr.vmem [resolvable:$true] %s315_s5 }
  0x12   :  { %s420_s6 = scalar_lea.vmem %s316_s5, 16  ;;  %s424_s10 = scalar_lea.vmem %s316_s5, 32 }
  0x13   :  { %390 = vmatpush3.bf16.msra.mxu0 %v413_v14  ;;  %p421_p0 = scmp.ne.s32.totalorder %s316_s5, %s420_s6  ;;  %p425_p1 = scmp.lt.s32.totalorder %s316_s5, %s316_s5 }
  0x14   :  { %376 = vmatpush3.bf16.msra.mxu1 %v408_v9  ;;  %391 = vmatprep.subr.bf16.mxu0 %v444_v1  ;;  %p426_p2 = scmp.lt.s32.totalorder %s424_s10, %s420_s6 }
  0x15   :  { %377 = vmatprep.subr.bf16.mxu1 %v444_v1 }
  0x16   :  { %p427_p3 = por %p426_p2, %p425_p1 }
  0x17   :  { %392 = vmatpush3.bf16.msra.mxu0 %v414_v23 }
  0x18   :  { %378 = vmatpush3.bf16.msra.mxu1 %v409_v10  ;;  %393 = vmatprep.subr.bf16.mxu0 %v444_v1  ;;  %p428_p4 = pnand %p427_p3, %p421_p0 }
  0x19   :  { %379 = vmatprep.subr.bf16.mxu1 %v444_v1 }
  0x1b   :  { %394 = vmatpush3.bf16.msra.mxu0 %v415_v24 }
  0x1c   :  { %380 = vmatpush3.bf16.msra.mxu1 %v410_v11 }
  0x1d   :  { %381 = vmatprep.subr.bf16.mxu1 %v444_v1 }
  0x20   :  { %382 = vmatpush3.bf16.msra.mxu1 %v411_v12 }
  0xdc   :  { %v91_v16 = vpop.f32.mrb[0].mxu0 }
  0xdd   :  { %v92_v17 = vadd.f32 %v323_v15, %v91_v16  ;;  %v365_v18 = vpop.f32.mrb[1].mxu0 }
  0xde   :  { %v94_v19 = vpop.f32.mrb[2].mxu0 }
  0xdf   :  { %v97_v20 = vmax.f32 %v92_v17, 0.0  ;;  %v366_v21 = vpop.f32.mrb[3].mxu0 }
  0xe1   :  { %v98_v22 = vpack.c.bf16 %v97_v20, %v97_v20 }
  0xe3   :  { %384 = vmatmul.mubr.bf16.vlgmr.msra.gmra.mrb[0].mxu1 %v98_v22 }
 0x1b6   :  { %v204_v26 = vpop.f32.mrb[0].mxu1 }
 0x1b7   :  { %v205_v27 = vadd.f32 %v327_v25, %v204_v26  ;;  %v385_v28 = vpop.f32.mrb[1].mxu1 }
 0x1b8   :  { %v207_v29 = vpop.f32.mrb[2].mxu1 }
 0x1b9   :  { %v210_v30 = vmax.f32 %v205_v27, 0.0  ;;  %v386_v31 = vpop.f32.mrb[3].mxu1 }
 0x1bb   :  { %v211_v32 = vpack.c.bf16 %v210_v30, %v210_v30 }
 0x1bd   :  { %396 = vmatmul.mubr.msk.bf16.vlgmr.msra.gmra.mrb[4].mxu0 %vm251_vm2, %v211_v32 }
 0x290   :  { %v289_v34 = vpop.f32.mrb[4].mxu0 }
 0x291   :  { %v290_v35 = vadd.f32 %v336_v33, %v289_v34  ;;  %v397_v36 = vpop.f32.mrb[5].mxu0 }
 0x292   :  { %v292_v37 = vpop.f32.mrb[6].mxu0 }
 0x293   :  { %v398_v38 = vpop.f32.mrb[7].mxu0  ;;  %v296_v39 = vsel %vm295_vm3, %v290_v35, -inf }
 0x294   :  { %297 = vmax.xlane.f32.xlu0 %v296_v39 }
 0x321   :  { %v298_v40 = vpop.xlane.xlu0 %297 }
 0x322   :  { %v299_v41 = vsub.f32 %v290_v35, %v298_v40 }
 0x324   :  { %v300_v42 = vmul.f32 1.442695, %v299_v41 }
 0x326   :  { %416 = vpow2.f32 %v300_v42 }
 0x330   :  { %v417_v43 = vpop.eup %416 }
 0x331   :  { %v302_v44 = vsel %vm295_vm3, %v417_v43, 0.0 }
 0x332   :  { %303 = vadd.xlane.f32.xlu0 %v302_v44 }
 0x3bf   :  { %v304_v45 = vpop.xlane.xlu0 %303 }
 0x3c0   :  { %418 = vrcp.f32 %v304_v45 }
 0x3ca   :  { %v419_v46 = vpop.eup %418 }
 0x3cb   :  { %v306_v47 = vmul.f32 %v419_v46, %v417_v43 }
 0x3cd   :  { %v307_v48 = vpack.c.bf16 %v306_v47, %v306_v47 }
 0x3cf   :  { %308 = vst [vmem:[#allocation2] sm:$0x1] %v307_v48 }
 0x3d0   :  { %431 = shalt.err (!%p428_p4)
}
 0x3d1   :  { %s432_s11 = scalar_lea.hbm %s563_s7, 16 }
 0x3d2   :  { %p433_p5 = scmp.ne.s32.totalorder %s563_s7, %s432_s11  ;;  %p436_p6 = scmp.lt.u32.totalorder %s432_s11, %s563_s7 }
 0x3d4   :  { %p438_p7 = pnand %p436_p6, %p433_p5 }
 0x3d6   :  { %441 = shalt.err (!%p438_p7)
}
 0x3d7   :  { %318 = dma.vmem_to_hbm [thread:$0]  %s316_s5, 16, %s563_s7, [#allocation3]  }
 0x3d8   :  { %442 = dma.done.wait [#allocation3], 16  }
 0x3d9   :  { %443 = vsyncadd [#allocation3], 4294967280 }
 0x3da   :  { %322 = vsyncpa [#allocation3], 1 }

</bundles_post_ra>
